<compile_context>
chip_gen: v5e
topology: v5e:2x2
jax: 0.10.0
libtpu: 0.0.40
codegen_flags: <defaults>
</compile_context>

<pallas_src>
import functools

import jax
import jax.numpy as jnp
from jax.experimental import pallas as pl
from jax.experimental.pallas import tpu as pltpu


def _round_up(a: int, b: int) -> int:
    return (a + b - 1) // b * b


def _vmem_limit_bytes() -> int:
    """Scoped-VMEM limit: ~3/4 of physical (≈96 MiB on v5e/v6e, ≈48 MiB on v7x)."""
    try:
        cap = int(getattr(pltpu.get_tpu_info(), "vmem_capacity_bytes", 64 << 20))
    except Exception:
        cap = 64 << 20
    return min(cap * 3 // 4, 112 << 20)


def ffn_kernel(x_ref, w1_ref, b1_ref, w2_ref, b2_ref, g_ref, beta_ref, o_ref,
               acc_ref=None, *, d_in_real, eps, num_h_steps):
    """One (row-tile, hidden-tile) grid step of the positionwise FFN."""
    # Matmul operands in the weights' dtype (bf16); everything else stays f32.
    x_mm = x_ref[...].astype(w1_ref.dtype)
    h = jnp.dot(x_mm, w1_ref[...], preferred_element_type=jnp.float32)
    h = jnp.maximum(h + b1_ref[...], 0.0)                       # bias + ReLU in f32
    part = jnp.dot(h.astype(w2_ref.dtype), w2_ref[...],
                   preferred_element_type=jnp.float32)

    def _epilogue(y_lin):
        # TODO(synk): dropout is identity here (inference / eval semantics).
        y = y_lin + b2_ref[...] + x_ref[...].astype(jnp.float32)   # f32 residual
        d_in_pad = y.shape[-1]
        if d_in_pad != d_in_real:
            col = jax.lax.broadcasted_iota(jnp.int32, y.shape, 1)
            mask = col < d_in_real
            y = jnp.where(mask, y, 0.0)
        inv_n = 1.0 / d_in_real
        mean = jnp.sum(y, axis=-1, keepdims=True) * inv_n
        cent = y - mean
        if d_in_pad != d_in_real:
            cent = jnp.where(mask, cent, 0.0)
        var = jnp.sum(cent * cent, axis=-1, keepdims=True) * inv_n
        y_n = cent * jax.lax.rsqrt(var + eps)
        o_ref[...] = (y_n * g_ref[...] + beta_ref[...]).astype(o_ref.dtype)

    if num_h_steps == 1:
        # Resident-weight fast path: no f32 accumulator round trip through VMEM.
        _epilogue(part)
    else:
        h_step = pl.program_id(1)

        @pl.when(h_step == 0)
        def _():
            acc_ref[...] = part            # write directly; skip zero-init store+load

        @pl.when(h_step > 0)
        def _():
            acc_ref[...] += part

        @pl.when(h_step == num_h_steps - 1)
        def _():
            _epilogue(acc_ref[...])


def positionwise_ffn(x, w1, b1, w2, b2, gamma, beta, *,
                     tile_m=512, matmul_dtype=jnp.bfloat16, eps=1e-6):
    """x: (B, S, d_in). w1: (d_in, d_hid), w2: (d_hid, d_in) (stored in->out)."""
    B, S, d_in = x.shape
    d_hid = w1.shape[1]
    M = B * S
    out_dtype = x.dtype

    x_bytes = jnp.dtype(x.dtype).itemsize
    mm_bytes = jnp.dtype(matmul_dtype).itemsize
    out_bytes = jnp.dtype(out_dtype).itemsize

    d_in_p = _round_up(d_in, 128)
    d_hid_128 = _round_up(d_hid, 128)

    # --- row tiling ---------------------------------------------------------
    tile_m = max(8, min(tile_m, _round_up(M, 8)))
    # Keep >=2 row tiles when there is enough work, so megacore (v7x, 2 TCs) can
    # shard the "parallel" axis instead of idling one core.
    if M >= 512 and _round_up(M, tile_m) // tile_m < 2:
        tile_m = _round_up((M + 1) // 2, 8)

    vmem_limit = _vmem_limit_bytes()
    budget = int(vmem_limit * 0.9)

    def vmem_usage(tm, th, resident):
        use = 2 * tm * d_in_p * x_bytes          # x blocks (double buffered)
        use += 2 * d_in_p * th * mm_bytes        # W1 blocks
        use += 2 * th * d_in_p * mm_bytes        # W2 blocks
        use += 2 * tm * d_in_p * out_bytes       # out blocks
        use += 2 * (th + 3 * d_in_p) * 4         # b1 / b2 / gamma / beta
        use += tm * th * 4                       # relu'd hidden temp (f32)
        if not resident:
            use += tm * d_in_p * 4               # f32 accumulator scratch
        return use

    # Shrink tile_m only if even the smallest hidden tile cannot fit (rare, huge d_in).
    while tile_m > 64 and vmem_usage(tile_m, 128, False) > budget:
        tile_m = max(64, _round_up(tile_m // 2, 8))
    m_pad = _round_up(M, tile_m)

    # --- hidden tiling: prefer fully VMEM-resident weights, else big tiles ---
    tile_h, d_hid_p = 128, _round_up(d_hid, 128)
    for th in (d_hid_128, 2048, 1024, 512, 256, 128):
        if th > d_hid_128:
            continue
        if vmem_usage(tile_m, th, th == d_hid_128) <= budget:
            tile_h, d_hid_p = th, _round_up(d_hid, th)
            break
    num_h_steps = d_hid_p // tile_h

    # --- padding (zeros keep the math exact: padded pre-LN lanes are 0) ------
    x2d = x.reshape(M, d_in)                      # native dtype: no bf16 copy in HBM
    if (m_pad, d_in_p) != (M, d_in):
        x2d = jnp.pad(x2d, ((0, m_pad - M), (0, d_in_p - d_in)))
    # TODO(synk): pre-pad / pre-cast W1, W2 once outside the hot path (at weight load).
    w1p = jnp.pad(w1, ((0, d_in_p - d_in), (0, d_hid_p - d_hid))).astype(matmul_dtype)
    w2p = jnp.pad(w2, ((0, d_hid_p - d_hid), (0, d_in_p - d_in))).astype(matmul_dtype)
    b1p = jnp.pad(b1, (0, d_hid_p - d_hid)).reshape(1, d_hid_p).astype(jnp.float32)
    b2p = jnp.pad(b2, (0, d_in_p - d_in)).reshape(1, d_in_p).astype(jnp.float32)
    g2d = jnp.pad(gamma, (0, d_in_p - d_in)).reshape(1, d_in_p).astype(jnp.float32)
    bt2d = jnp.pad(beta, (0, d_in_p - d_in)).reshape(1, d_in_p).astype(jnp.float32)

    grid = (m_pad // tile_m, num_h_steps)
    kernel = functools.partial(ffn_kernel, d_in_real=d_in, eps=eps,
                               num_h_steps=num_h_steps)
    scratch = [] if num_h_steps == 1 else [pltpu.VMEM((tile_m, d_in_p), jnp.float32)]

    n_row_tiles = m_pad // tile_m
    weight_passes = 1 if num_h_steps == 1 else n_row_tiles
    bytes_accessed = int(M * d_in * (x_bytes + out_bytes)
                         + weight_passes * (w1p.size + w2p.size) * mm_bytes
                         + (b1p.size + b2p.size + g2d.size + bt2d.size) * 4)
    cost = pl.CostEstimate(flops=4 * M * d_in * d_hid, transcendentals=M,
                           bytes_accessed=bytes_accessed)

    out_pad = pl.pallas_call(
        kernel,
        out_shape=jax.ShapeDtypeStruct((m_pad, d_in_p), out_dtype),
        grid_spec=pltpu.PrefetchScalarGridSpec(
            num_scalar_prefetch=0,
            grid=grid,
            in_specs=[
                pl.BlockSpec((tile_m, d_in_p), lambda i, h: (i, 0)),   # x row tile
                pl.BlockSpec((d_in_p, tile_h), lambda i, h: (0, h)),   # W1 hidden tile
                pl.BlockSpec((1, tile_h),      lambda i, h: (0, h)),   # b1 hidden tile
                pl.BlockSpec((tile_h, d_in_p), lambda i, h: (h, 0)),   # W2 hidden tile
                pl.BlockSpec((1, d_in_p),      lambda i, h: (0, 0)),   # b2
                pl.BlockSpec((1, d_in_p),      lambda i, h: (0, 0)),   # gamma
                pl.BlockSpec((1, d_in_p),      lambda i, h: (0, 0)),   # beta
            ],
            out_specs=pl.BlockSpec((tile_m, d_in_p), lambda i, h: (i, 0)),
            scratch_shapes=scratch,
        ),
        compiler_params=pltpu.CompilerParams(
            dimension_semantics=("parallel", "arbitrary"),
            vmem_limit_bytes=vmem_limit),
        cost_estimate=cost,
    )(x2d, w1p, b1p, w2p, b2p, g2d, bt2d)

    return out_pad[:M, :d_in].reshape(B, S, d_in)


def reference_ffn(x, w1, b1, w2, b2, gamma, beta, eps=1e-6, matmul_dtype=jnp.float32):
    """Pure-JAX reference; matmul_dtype mirrors the kernel's MXU operand precision.
    Residual and LayerNorm epilogue are in f32, like the kernel."""
    h = jnp.einsum("bsd,dh->bsh", x.astype(matmul_dtype), w1.astype(matmul_dtype),
                   preferred_element_type=jnp.float32) + b1
    h = jnp.maximum(h, 0.0)
    y = jnp.einsum("bsh,hd->bsd", h.astype(matmul_dtype), w2.astype(matmul_dtype),
                   preferred_element_type=jnp.float32)
    y = y + b2 + x.astype(jnp.float32)
    mean = jnp.mean(y, axis=-1, keepdims=True)
    var = jnp.mean((y - mean) ** 2, axis=-1, keepdims=True)
    return ((y - mean) * jax.lax.rsqrt(var + eps) * gamma + beta).astype(x.dtype)


if __name__ == "__main__":
    B, S = 2, 8
    d_in, d_hid = 32, 64

    key = jax.random.PRNGKey(0)
    kx, k1, k2, k3, k4 = jax.random.split(key, 5)

    x = jax.random.normal(kx, (B, S, d_in), dtype=jnp.float32)
    w1 = jax.random.normal(k1, (d_in, d_hid), dtype=jnp.float32) / jnp.sqrt(d_in)
    b1 = jax.random.normal(k2, (d_hid,), dtype=jnp.float32) * 0.01
    w2 = jax.random.normal(k3, (d_hid, d_in), dtype=jnp.float32) / jnp.sqrt(d_hid)
    b2 = jax.random.normal(k4, (d_in,), dtype=jnp.float32) * 0.01
    gamma = jnp.ones((d_in,), dtype=jnp.float32)
    beta = jnp.zeros((d_in,), dtype=jnp.float32)

    out = positionwise_ffn(x, w1, b1, w2, b2, gamma, beta)
    out = jax.block_until_ready(out)
    assert out.shape == (B, S, d_in)

    # Matched-precision reference (bf16 MXU operands, f32 accumulation/residual/epilogue).
    ref_bf16 = reference_ffn(x, w1, b1, w2, b2, gamma, beta, matmul_dtype=jnp.bfloat16)
    assert jnp.allclose(out, ref_bf16, atol=1e-3, rtol=1e-3), \
        "mismatch vs matched-precision reference"

    # Sanity check against the full-f32 reference (loose tol covers bf16 operand rounding).
    ref_f32 = reference_ffn(x, w1, b1, w2, b2, gamma, beta, matmul_dtype=jnp.float32)
    assert jnp.allclose(out, ref_f32, atol=5e-2, rtol=5e-2), "mismatch vs f32 reference"

    print("KERNEL_OK")
</pallas_src>

<mosaic_0001>
module attributes {stable_mosaic.version = 11 : i64} {
  func.func @ffn_kernel(%arg0: i32, %arg1: i32, %arg2: memref<16x128xf32, #tpu.memory_space<vmem>>, %arg3: memref<128x128xbf16, #tpu.memory_space<vmem>>, %arg4: memref<1x128xf32, #tpu.memory_space<vmem>>, %arg5: memref<128x128xbf16, #tpu.memory_space<vmem>>, %arg6: memref<1x128xf32, #tpu.memory_space<vmem>>, %arg7: memref<1x128xf32, #tpu.memory_space<vmem>>, %arg8: memref<1x128xf32, #tpu.memory_space<vmem>>, %arg9: memref<16x128xf32, #tpu.memory_space<vmem>>) attributes {dimension_semantics = [#tpu.dimension_semantics<parallel>, #tpu.dimension_semantics<arbitrary>], iteration_bounds = array<i64: 1, 1>, scalar_prefetch = 0 : i64, scratch_operands = 0 : i64, tpu.core_type = #tpu.core_type<tc>, window_params = [{transform_indices = @transform_0, window_bounds = array<i64: 16, 128>}, {transform_indices = @transform_1, window_bounds = array<i64: 128, 128>}, {transform_indices = @transform_2, window_bounds = array<i64: 1, 128>}, {transform_indices = @transform_3, window_bounds = array<i64: 128, 128>}, {pipeline_mode = #tpu.pipeline_mode<synchronous>, transform_indices = @transform_4, window_bounds = array<i64: 1, 128>}, {pipeline_mode = #tpu.pipeline_mode<synchronous>, transform_indices = @transform_5, window_bounds = array<i64: 1, 128>}, {pipeline_mode = #tpu.pipeline_mode<synchronous>, transform_indices = @transform_6, window_bounds = array<i64: 1, 128>}, {transform_indices = @transform_7, window_bounds = array<i64: 16, 128>}]} {
    %c0 = arith.constant 0 : index
    %c0_0 = arith.constant 0 : index
    %0 = vector.load %arg2[%c0, %c0_0] : memref<16x128xf32, #tpu.memory_space<vmem>>, vector<16x128xf32>
    %1 = arith.truncf %0 : vector<16x128xf32> to vector<16x128xbf16>
    %c0_1 = arith.constant 0 : index
    %c0_2 = arith.constant 0 : index
    %2 = vector.load %arg3[%c0_1, %c0_2] : memref<128x128xbf16, #tpu.memory_space<vmem>>, vector<128x128xbf16>
    %cst = arith.constant dense<0.000000e+00> : vector<16x128xf32>
    %3 = tpu.matmul %1, %2, %cst {dimension_numbers = #tpu.dot_dimension_numbers<[1], [0], [0], [1], [0, 0, 1, 1], [], []>} : vector<16x128xbf16>, vector<128x128xbf16>, vector<16x128xf32> -> vector<16x128xf32>
    %c0_3 = arith.constant 0 : index
    %c0_4 = arith.constant 0 : index
    %4 = vector.load %arg4[%c0_3, %c0_4] : memref<1x128xf32, #tpu.memory_space<vmem>>, vector<1x128xf32>
    %5 = vector.broadcast %4 : vector<1x128xf32> to vector<16x128xf32>
    %6 = arith.addf %3, %5 : vector<16x128xf32>
    %cst_5 = arith.constant 0.000000e+00 : f32
    %7 = vector.broadcast %cst_5 : f32 to vector<16x128xf32>
    %8 = arith.maximumf %6, %7 : vector<16x128xf32>
    %9 = arith.truncf %8 : vector<16x128xf32> to vector<16x128xbf16>
    %c0_6 = arith.constant 0 : index
    %c0_7 = arith.constant 0 : index
    %10 = vector.load %arg5[%c0_6, %c0_7] : memref<128x128xbf16, #tpu.memory_space<vmem>>, vector<128x128xbf16>
    %cst_8 = arith.constant dense<0.000000e+00> : vector<16x128xf32>
    %11 = tpu.matmul %9, %10, %cst_8 {dimension_numbers = #tpu.dot_dimension_numbers<[1], [0], [0], [1], [0, 0, 1, 1], [], []>} : vector<16x128xbf16>, vector<128x128xbf16>, vector<16x128xf32> -> vector<16x128xf32>
    %c0_9 = arith.constant 0 : index
    %c0_10 = arith.constant 0 : index
    %12 = vector.load %arg6[%c0_9, %c0_10] : memref<1x128xf32, #tpu.memory_space<vmem>>, vector<1x128xf32>
    %13 = vector.broadcast %12 : vector<1x128xf32> to vector<16x128xf32>
    %14 = arith.addf %11, %13 : vector<16x128xf32>
    %c0_11 = arith.constant 0 : index
    %c0_12 = arith.constant 0 : index
    %15 = vector.load %arg2[%c0_11, %c0_12] : memref<16x128xf32, #tpu.memory_space<vmem>>, vector<16x128xf32>
    %16 = arith.addf %14, %15 : vector<16x128xf32>
    %17 = tpu.iota {dimensions = array<i32: 1>} : vector<16x128xi32>
    %c32_i32 = arith.constant 32 : i32
    %18 = vector.broadcast %c32_i32 : i32 to vector<16x128xi32>
    %19 = arith.cmpi slt, %17, %18 : vector<16x128xi32>
    %cst_13 = arith.constant 0.000000e+00 : f32
    %20 = vector.broadcast %cst_13 : f32 to vector<16x128xf32>
    %21 = arith.select %19, %16, %20 : vector<16x128xi1>, vector<16x128xf32>
    %cst_14 = arith.constant dense<0.000000e+00> : vector<16xf32>
    %22 = vector.multi_reduction <add>, %21, %cst_14 [1] : vector<16x128xf32> to vector<16xf32>
    %23 = vector.shape_cast %22 : vector<16xf32> to vector<16x1xf32>
    %cst_15 = arith.constant 3.125000e-02 : f32
    %24 = vector.broadcast %cst_15 : f32 to vector<16x1xf32>
    %25 = arith.mulf %23, %24 : vector<16x1xf32>
    %26 = vector.broadcast %25 : vector<16x1xf32> to vector<16x128xf32>
    %27 = arith.subf %21, %26 : vector<16x128xf32>
    %cst_16 = arith.constant 0.000000e+00 : f32
    %28 = vector.broadcast %cst_16 : f32 to vector<16x128xf32>
    %29 = arith.select %19, %27, %28 : vector<16x128xi1>, vector<16x128xf32>
    %30 = arith.mulf %29, %29 : vector<16x128xf32>
    %cst_17 = arith.constant dense<0.000000e+00> : vector<16xf32>
    %31 = vector.multi_reduction <add>, %30, %cst_17 [1] : vector<16x128xf32> to vector<16xf32>
    %32 = vector.shape_cast %31 : vector<16xf32> to vector<16x1xf32>
    %cst_18 = arith.constant 3.125000e-02 : f32
    %33 = vector.broadcast %cst_18 : f32 to vector<16x1xf32>
    %34 = arith.mulf %32, %33 : vector<16x1xf32>
    %cst_19 = arith.constant 9.99999997E-7 : f32
    %35 = vector.broadcast %cst_19 : f32 to vector<16x1xf32>
    %36 = arith.addf %34, %35 : vector<16x1xf32>
    %37 = math.rsqrt %36 : vector<16x1xf32>
    %38 = vector.broadcast %37 : vector<16x1xf32> to vector<16x128xf32>
    %39 = arith.mulf %29, %38 : vector<16x128xf32>
    %c0_20 = arith.constant 0 : index
    %c0_21 = arith.constant 0 : index
    %40 = vector.load %arg7[%c0_20, %c0_21] : memref<1x128xf32, #tpu.memory_space<vmem>>, vector<1x128xf32>
    %41 = vector.broadcast %40 : vector<1x128xf32> to vector<16x128xf32>
    %42 = arith.mulf %39, %41 : vector<16x128xf32>
    %c0_22 = arith.constant 0 : index
    %c0_23 = arith.constant 0 : index
    %43 = vector.load %arg8[%c0_22, %c0_23] : memref<1x128xf32, #tpu.memory_space<vmem>>, vector<1x128xf32>
    %44 = vector.broadcast %43 : vector<1x128xf32> to vector<16x128xf32>
    %45 = arith.addf %42, %44 : vector<16x128xf32>
    %c0_24 = arith.constant 0 : index
    %c0_25 = arith.constant 0 : index
    %46 = vector.load %arg9[%c0_24, %c0_25] : memref<16x128xf32, #tpu.memory_space<vmem>>, vector<16x128xf32>
    tpu.vector_store %arg9[%c0_24, %c0_25], %45 {strides = array<i32>} : memref<16x128xf32, #tpu.memory_space<vmem>>, vector<16x128xf32>,
    return
  }
  func.func @transform_0(%arg0: i32, %arg1: i32) -> (i32, i32) {
    %c0_i32 = arith.constant 0 : i32
    %c0_i32_0 = arith.constant 0 : i32
    return %arg0, %c0_i32 : i32, i32
  }
  func.func @transform_1(%arg0: i32, %arg1: i32) -> (i32, i32) {
    %c0_i32 = arith.constant 0 : i32
    %c0_i32_0 = arith.constant 0 : i32
    return %c0_i32, %arg1 : i32, i32
  }
  func.func @transform_2(%arg0: i32, %arg1: i32) -> (i32, i32) {
    %c0_i32 = arith.constant 0 : i32
    %c0_i32_0 = arith.constant 0 : i32
    return %c0_i32, %arg1 : i32, i32
  }
  func.func @transform_3(%arg0: i32, %arg1: i32) -> (i32, i32) {
    %c0_i32 = arith.constant 0 : i32
    %c0_i32_0 = arith.constant 0 : i32
    return %arg1, %c0_i32 : i32, i32
  }
  func.func @transform_4(%arg0: i32, %arg1: i32) -> (i32, i32) {
    %c0_i32 = arith.constant 0 : i32
    %c0_i32_0 = arith.constant 0 : i32
    %c0_i32_1 = arith.constant 0 : i32
    return %c0_i32, %c0_i32_0 : i32, i32
  }
  func.func @transform_5(%arg0: i32, %arg1: i32) -> (i32, i32) {
    %c0_i32 = arith.constant 0 : i32
    %c0_i32_0 = arith.constant 0 : i32
    %c0_i32_1 = arith.constant 0 : i32
    return %c0_i32, %c0_i32_0 : i32, i32
  }
  func.func @transform_6(%arg0: i32, %arg1: i32) -> (i32, i32) {
    %c0_i32 = arith.constant 0 : i32
    %c0_i32_0 = arith.constant 0 : i32
    %c0_i32_1 = arith.constant 0 : i32
    return %c0_i32, %c0_i32_0 : i32, i32
  }
  func.func @transform_7(%arg0: i32, %arg1: i32) -> (i32, i32) {
    %c0_i32 = arith.constant 0 : i32
    %c0_i32_0 = arith.constant 0 : i32
    return %arg0, %c0_i32 : i32, i32
  }
}

</mosaic_0001>

<bundles_post_ra>
// kernel: tpu_custom_call.1
= control target key start
LH: loop header
LB: loop body
LE: loop exit
PB: predicated region body
PF: predicated region fallthrough
CT: control target
= control target key end

     0   :  { %12 = vsyncpa [#allocation3], 0  ;;  %s607_s0 = inlined_call_operand.hbm [shape: f32[16,128], index: 0, kind: input, shape index: {}]   ;;  %s608_s1 = inlined_call_operand.hbm [shape: bf16[128,128], index: 1, kind: input, shape index: {}]   ;;  %s609_s2 = inlined_call_operand.vmem [shape: f32[1,128], index: 2, kind: input, shape index: {}]   ;;  %s610_s3 = inlined_call_operand.hbm [shape: bf16[128,128], index: 3, kind: input, shape index: {}]   ;;  %s611_s4 = inlined_call_operand.vmem [shape: f32[1,128], index: 4, kind: input, shape index: {}]   ;;  %s612_s5 = inlined_call_operand.vmem [shape: f32[1,128], index: 5, kind: input, shape index: {}]   ;;  %s613_s6 = inlined_call_operand.vmem [shape: f32[1,128], index: 6, kind: input, shape index: {}]   ;;  %s614_s7 = inlined_call_operand.hbm [shape: f32[16,128], index: 7, kind: output, shape index: {}]  }
   0x1   :  { %13 = vsyncpa [#allocation6], 0  ;;  %s32_s26 = sshll.u32 %s608_s1, 4  ;;  %s33_s26 = int_to_ptr.hbm [resolvable:$true] %s32_s26 }
   0x2   :  { %14 = vsyncpa [#allocation4], 0  ;;  %s525_s27 = smov [#allocation5]   ;;  %s19_s8 = sshll.u32 %s607_s0, 4  ;;  %s20_s8 = int_to_ptr.hbm [resolvable:$true] %s19_s8 }
   0x3   :  { %s34_s28 = sshll.u32 %s525_s27, 4  ;;  %s526_s9 = smov 64   ;;  %s35_s28 = int_to_ptr.vmem [resolvable:$true] %s34_s28 }
   0x4   :  { %s527_s10 = smov 4   ;;  %s528_s11 = smov [#allocation2]  }
   0x5   :  { %40 = dma.hbm_to_vmem [thread:$0]  %s33_s26, 1024, %s35_s28, [#allocation6], %s526_s9, %s526_s9, %s527_s10  }
   0x6   :  { %s21_s12 = sshll.u32 %s528_s11, 4  ;;  %s529_s13 = smov 128   ;;  %s22_s12 = int_to_ptr.vmem [resolvable:$true] %s21_s12 }
   0x7   :  { %s530_s14 = smov 8   ;;  %s47_s16 = sshll.u32 %s610_s3, 4  ;;  %s48_s16 = int_to_ptr.hbm [resolvable:$true] %s47_s16 }
   0x8   :  { %27 = dma.hbm_to_vmem [thread:$0]  %s20_s8, 256, %s22_s12, [#allocation3], %s529_s13, %s529_s13, %s530_s14  }
   0x9   :  { %s531_s17 = smov [#allocation7]  }
   0xa   :  { %s49_s0 = sshll.u32 %s531_s17, 4  ;;  %s50_s0 = int_to_ptr.vmem [resolvable:$true] %s49_s0 }
   0xb   :  { %55 = dma.hbm_to_vmem [thread:$0]  %s48_s16, 1024, %s50_s0, [#allocation6], %s526_s9, %s526_s9, %s527_s10  }
   0xc   :  { %519 = dma.done.wait [#allocation3], 256  }
   0xd   :  { %520 = vsyncadd [#allocation3], 4294967040 }
   0xe   :  { %521 = dma.done.wait [#allocation6], 2048  }
   0xf   :  { %522 = vsyncadd [#allocation6], 4294965248  ;;  %v398_v0 = vld [vmem:[#allocation5 + $0x38] sm:$0xff]  ;;  %v397_v1 = vld [vmem:[#allocation5 + $0x30] sm:$0xff]  ;;  %v246_v27 = vlaneseq  ;;  %s532_s23 = smov [#allocation8]   ;;  %s313_s26 = sshll.u32 %s614_s7, 4  ;;  %s314_s26 = int_to_ptr.hbm [resolvable:$true] %s313_s26 }
  0x10   :  { %145 = vmatpush.bf16.msra.mxu0 %v398_v0  ;;  %v406_v2 = vld [vmem:[#allocation7 + $0x38] sm:$0xff]  ;;  %v405_v3 = vld [vmem:[#allocation7 + $0x30] sm:$0xff]  ;;  %v396_v4 = vld [vmem:[#allocation5 + $0x28] sm:$0xff] }
  0x11   :  { %230 = vmatpush.bf16.msra.mxu1 %v406_v2  ;;  %v404_v5 = vld [vmem:[#allocation7 + $0x28] sm:$0xff]  ;;  %v395_v6 = vld [vmem:[#allocation5 + $0x20] sm:$0xff]  ;;  %v394_v8 = vld [vmem:[#allocation5 + $0x18] sm:$0xff]  ;;  %v247_v29 = vand.u32 127, %v246_v27 }
  0x12   :  { %v403_v7 = vld [vmem:[#allocation7 + $0x20] sm:$0xff]  ;;  %v393_v9 = vld [vmem:[#allocation5 + $0x10] sm:$0xff]  ;;  %v392_v10 = vld [vmem:[#allocation5 + $0x8] sm:$0xff] }
  0x13   :  { %v391_v11 = vld [vmem:[#allocation5] sm:$0xff]  ;;  %v74_v12 = vld [vmem:[#allocation2] sm:$0xff]  ;;  %v75_v13 = vld [vmem:[#allocation2 + $0x8] sm:$0xff]  ;;  %vm248_vm0 = vcmp.lt.s32.totalorder %v247_v29, 32 }
  0x14   :  { %146 = vmatpush.bf16.msra.mxu0 %v397_v1  ;;  %v76_v14 = vpack.c.bf16 %v75_v13, %v74_v12  ;;  %v402_v15 = vld [vmem:[#allocation7 + $0x18] sm:$0xff]  ;;  %v401_v16 = vld [vmem:[#allocation7 + $0x10] sm:$0xff]  ;;  %v400_v17 = vld [vmem:[#allocation7 + $0x8] sm:$0xff] }
  0x15   :  { %231 = vmatpush.bf16.msra.mxu1 %v405_v3  ;;  %v399_v18 = vld [vmem:[#allocation7] sm:$0xff]  ;;  %v415_v20 = vld [vmem:[%s609_s2] ss:$0 sm:$0xff] }
  0x16   :  { %v416_v28 = vld [vmem:[%s611_s4] ss:$0 sm:$0xff] }
  0x17   :  { %v417_v62 = vld [vmem:[%s612_s5] ss:$0 sm:$0xff]  ;;  %s311_s5 = sshll.u32 %s532_s23, 4  ;;  %s312_s5 = int_to_ptr.vmem [resolvable:$true] %s311_s5 }
  0x18   :  { %147 = vmatpush.bf16.msra.mxu0 %v396_v4  ;;  %v418_v2 = vld [vmem:[%s613_s6] ss:$0 sm:$0xff] }
  0x19   :  { %232 = vmatpush.bf16.msra.mxu1 %v404_v5 }
  0x1c   :  { %148 = vmatpush.bf16.msra.mxu0 %v395_v6 }
  0x1d   :  { %233 = vmatpush.bf16.msra.mxu1 %v403_v7 }
  0x20   :  { %149 = vmatpush.bf16.msra.mxu0 %v394_v8 }
  0x21   :  { %234 = vmatpush.bf16.msra.mxu1 %v402_v15 }
  0x24   :  { %150 = vmatpush.bf16.msra.mxu0 %v393_v9 }
  0x25   :  { %235 = vmatpush.bf16.msra.mxu1 %v401_v16 }
  0x28   :  { %151 = vmatpush.bf16.msra.mxu0 %v392_v10 }
  0x29   :  { %236 = vmatpush.bf16.msra.mxu1 %v400_v17 }
  0x2c   :  { %152 = vmatpush.bf16.msra.mxu0 %v391_v11 }
  0x2d   :  { %237 = vmatpush.bf16.msra.mxu1 %v399_v18 }
  0x2f   :  { %153 = vmatmul.bf16.vlgmr.msra.gmra.mxu0 %v76_v14 }
  0xac   :  { %v154_v19 = vpop.f32.mrf.mxu0 }
  0xad   :  { %v155_v21 = vadd.f32 %v415_v20, %v154_v19 }
  0xaf   :  { %v159_v24 = vmax.f32 %v155_v21, 0.0 }
  0xb4   :  { %v156_v22 = vpop.f32.mrf.mxu0 }
  0xb5   :  { %v157_v23 = vadd.f32 %v415_v20, %v156_v22 }
  0xb7   :  { %v160_v25 = vmax.f32 %v157_v23, 0.0 }
  0xb9   :  { %v161_v26 = vpack.c.bf16 %v160_v25, %v159_v24 }
  0xbb   :  { %238 = vmatmul.bf16.vlgmr.msra.gmra.mxu1 %v161_v26 }
 0x138   :  { %v239_v30 = vpop.f32.mrf.mxu1 }
 0x139   :  { %v240_v31 = vadd.f32 %v416_v28, %v239_v30 }
 0x13b   :  { %v244_v32 = vadd.f32 %v240_v31, %v74_v12 }
 0x13d   :  { %v249_v33 = vsel %vm248_vm0, %v244_v32, 0.0 }
 0x13e   :  { %251 = vadd.xlane.f32.xlu0 %v249_v33 }
 0x140   :  { %v241_v34 = vpop.f32.mrf.mxu1 }
 0x141   :  { %v242_v35 = vadd.f32 %v416_v28, %v241_v34 }
 0x143   :  { %v245_v36 = vadd.f32 %v242_v35, %v75_v13 }
 0x145   :  { %v250_v37 = vsel %vm248_vm0, %v245_v36, 0.0 }
 0x146   :  { %253 = vadd.xlane.f32.xlu0 %v250_v37 }
 0x1b1   :  { %v252_v38 = vpop.xlane.xlu0 %251 }
 0x1b2   :  { %v255_v39 = vmul.f32 0.03125, %v252_v38 }
 0x1b4   :  { %v257_v40 = vsub.f32 %v249_v33, %v255_v39 }
 0x1b6   :  { %v259_v41 = vsel %vm248_vm0, %v257_v40, 0.0 }
 0x1b7   :  { %v261_v42 = vmul.f32 %v259_v41, %v259_v41 }
 0x1b9   :  { %263 = vadd.xlane.f32.xlu1 %v261_v42  ;;  %v254_v43 = vpop.xlane.xlu0 %253 }
 0x1ba   :  { %v256_v44 = vmul.f32 0.03125, %v254_v43 }
 0x1bc   :  { %v258_v45 = vsub.f32 %v250_v37, %v256_v44 }
 0x1be   :  { %v260_v46 = vsel %vm248_vm0, %v258_v45, 0.0 }
 0x1bf   :  { %v262_v47 = vmul.f32 %v260_v46, %v260_v46 }
 0x1c1   :  { %265 = vadd.xlane.f32.xlu1 %v262_v47 }
 0x22c   :  { %v264_v48 = vpop.xlane.xlu1 %263 }
 0x22d   :  { %v267_v49 = vmul.f32 0.03125, %v264_v48 }
 0x22f   :  { %v269_v50 = vadd.f32 1e-06, %v267_v49 }
 0x231   :  { %419 = vrsqrt.f32 %v269_v50  ;;  %vm277_vm2 = vweird.f32 %v269_v50 }
 0x234   :  { %v266_v51 = vpop.xlane.xlu1 %265 }
 0x235   :  { %v268_v52 = vmul.f32 0.03125, %v266_v51 }
 0x237   :  { %v420_v53 = vpop.eup %419  ;;  %v270_v54 = vadd.f32 1e-06, %v268_v52 }
 0x238   :  { %v272_v55 = vmul.f32 %v420_v53, %v269_v50  ;;  %vm278_vm1 = vweird.f32 %v420_v53 }
 0x239   :  { %421 = vrsqrt.f32 %v270_v54  ;;  %vm279_vm3 = vmor %vm277_vm2, %vm278_vm1  ;;  %vm287_vm5 = vweird.f32 %v270_v54 }
 0x23a   :  { %v273_v56 = vmul.f32 %v420_v53, %v272_v55 }
 0x23c   :  { %v274_v57 = vmul.f32 0.5, %v273_v56 }
 0x23e   :  { %v275_v58 = vsub.f32 1.5, %v274_v57 }
 0x23f   :  { %v422_v59 = vpop.eup %421 }
 0x240   :  { %v276_v60 = vmul.f32 %v420_v53, %v275_v58  ;;  %v282_v61 = vmul.f32 %v422_v59, %v270_v54  ;;  %vm288_vm4 = vweird.f32 %v422_v59 }
 0x241   :  { %vm289_vm6 = vmor %vm287_vm5, %vm288_vm4 }
 0x242   :  { %v280_v63 = vsel %vm279_vm3, %v420_v53, %v276_v60  ;;  %v283_v0 = vmul.f32 %v422_v59, %v282_v61 }
 0x243   :  { %v291_v1 = vmul.f32 %v280_v63, %v259_v41 }
 0x244   :  { %v284_v3 = vmul.f32 0.5, %v283_v0 }
 0x245   :  { %v297_v4 = vmul.f32 %v417_v62, %v291_v1 }
 0x246   :  { %v285_v5 = vsub.f32 1.5, %v284_v3 }
 0x247   :  { %v303_v6 = vadd.f32 %v418_v2, %v297_v4 }
 0x248   :  { %v286_v7 = vmul.f32 %v422_v59, %v285_v5 }
 0x249   :  { %305 = vst [vmem:[#allocation8] sm:$0xff] %v303_v6 }
 0x24a   :  { %v290_v8 = vsel %vm289_vm6, %v422_v59, %v286_v7 }
 0x24b   :  { %v292_v9 = vmul.f32 %v290_v8, %v260_v46 }
 0x24d   :  { %v298_v10 = vmul.f32 %v417_v62, %v292_v9 }
 0x24f   :  { %v304_v11 = vadd.f32 %v418_v2, %v298_v10 }
 0x251   :  { %306 = vst [vmem:[#allocation8 + $0x8] sm:$0xff] %v304_v11 }
 0x252   :  { %319 = dma.vmem_to_hbm [thread:$0]  %s312_s5, 256, %s314_s26, [#allocation4], %s529_s13, %s529_s13, %s530_s14  }
 0x253   :  { %523 = dma.done.wait [#allocation4], 256  }
 0x254   :  { %524 = vsyncadd [#allocation4], 4294967040 }
 0x255   :  { %324 = vsyncpa [#allocation3], 1 }
 0x256   :  { %325 = vsyncpa [#allocation6], 1 }
 0x257   :  { %326 = vsyncpa [#allocation4], 1 }

</bundles_post_ra>
